<compile_context>
chip_gen: v7x
topology: tpu7x:2x2x1
jax: 0.10.0
libtpu: 0.0.40
codegen_flags: <defaults>
</compile_context>

<pallas_src>
import functools
import math

import jax
import jax.numpy as jnp
from jax import lax
from jax.experimental import pallas as pl
from jax.experimental.pallas import tpu as pltpu

_INV_LN2 = 1.0 / math.log(2.0)
_LANE = 128
_SUBLANE = 8
_TN_MAX = 4096                       # max lane-tile width
_MAX_TILE_ELEMS = 128 * 4096         # ~2 MiB f32 per tile -> ~12 MiB live VMEM


def _round_up(a, b):
    return (a + b - 1) // b * b


def _cdiv(a, b):
    return (a + b - 1) // b


def _entropy_kernel(p_ref, x_ref, prob_ref, xq_ref, part_ref, *,
                    r_valid, s_valid, r_tile, s_tile,
                    need_row_mask, need_col_mask):
    # p_ref: (r_tile, 11) pre-transformed per-row params:
    #   [sp_h1, b1, ta1, sp_h2, b2, ta2, sp_h3, b3, ta3, sp_h4, b4]
    p = p_ref[...]
    x = jnp.round(x_ref[...])                       # eval-mode quantization

    sp1, b1, ta1 = p[:, 0:1], p[:, 1:2], p[:, 2:3]
    sp2, b2, ta2 = p[:, 3:4], p[:, 4:5], p[:, 5:6]
    sp3, b3, ta3 = p[:, 6:7], p[:, 7:8], p[:, 8:9]
    sp4, b4 = p[:, 9:10], p[:, 10:11]

    def bit_estimator(z):
        z = z * sp1 + b1
        z = z + jnp.tanh(z) * ta1
        z = z * sp2 + b2
        z = z + jnp.tanh(z) * ta2
        z = z * sp3 + b3
        z = z + jnp.tanh(z) * ta3
        z = z * sp4 + b4
        # sigmoid(z) == 0.5*(tanh(z/2)+1): single EUP op (vs exp + reciprocal).
        return 0.5 * (jnp.tanh(0.5 * z) + 1.0)

    prob = bit_estimator(x + 0.5) - bit_estimator(x - 0.5)

    prob_ref[...] = prob
    xq_ref[...] = x

    bits = jnp.clip(-jnp.log(prob + 1e-8) * _INV_LN2, 1e-10, 50.0)

    # Edge-block masks (only emitted when a dimension does not divide evenly).
    # jnp.where (not multiply) so garbage/NaN values read from the unwritten
    # part of a partial input block can never poison the sum.
    if need_col_mask:
        col = (pl.program_id(1) * s_tile
               + lax.broadcasted_iota(jnp.int32, (r_tile, s_tile), 1))
        bits = jnp.where(col < s_valid, bits, 0.0)

    # Lane-axis reduce (XLU) -> per-row partials, then mask padded rows cheaply.
    row_part = jnp.sum(bits, axis=1, keepdims=True)          # (r_tile, 1)
    if need_row_mask:
        row = (pl.program_id(0) * r_tile
               + lax.broadcasted_iota(jnp.int32, (r_tile, 1), 0))
        row_part = jnp.where(row < r_valid, row_part, 0.0)

    # Finish the reduction in-kernel (XLU has slack) -> one element per tile.
    part_ref[...] = jnp.sum(row_part, axis=0, keepdims=True)  # (1, 1)


def _pick_tiles(R, S, tn_max, max_tile_elems):
    # Lane tile: keep the whole spatial axis when it fits, else split it into
    # near-equal multiples of 128 so edge waste is < 1 tile.
    if S <= tn_max:
        tn, num_s = S, 1
    else:
        num_s = _cdiv(S, tn_max)
        tn = _round_up(_cdiv(S, num_s), _LANE)
        num_s = _cdiv(S, tn)

    # Row tile: big enough to amortize per-grid-step overhead (~0.35 us) but
    # bounded so live VMEM (2 buffers x {x, prob, xq}) stays ~12 MiB.
    max_rows = max(_SUBLANE, (max_tile_elems // max(tn, 1)) // _SUBLANE * _SUBLANE)
    if R <= max_rows:
        rt, num_r = R, 1
    else:
        num_r = _cdiv(R, max_rows)
        rt = _round_up(_cdiv(R, num_r), _SUBLANE)
        num_r = _cdiv(R, rt)
    return rt, num_r, tn, num_s


def entropy_block_forward(x_nchw, params, *,
                          tn_max=_TN_MAX, max_tile_elems=_MAX_TILE_ELEMS):
    """x_nchw: [B, C, H, W] float32.  params: [C, 11] float32
    (raw columns: h1,b1,a1, h2,b2,a2, h3,b3,a3, h4,b4)."""
    B, C, H, W = x_nchw.shape
    R, S = B * C, H * W

    # Precompute softplus(h) / tanh(a) once (tiny, C x 11) -> fewer EUP ops
    # per element inside the kernel.
    sp = jax.nn.softplus(params)
    th = jnp.tanh(params)
    p_t = jnp.stack(
        [sp[:, 0], params[:, 1], th[:, 2],
         sp[:, 3], params[:, 4], th[:, 5],
         sp[:, 6], params[:, 7], th[:, 8],
         sp[:, 9], params[:, 10]], axis=1)
    p_rows = jnp.tile(p_t, (B, 1))                  # row b*C + c -> channel c

    x2 = x_nchw.reshape(R, S)                       # free view: no transpose, no pad

    rt, num_r, tn, num_s = _pick_tiles(R, S, tn_max, max_tile_elems)
    kernel = functools.partial(
        _entropy_kernel,
        r_valid=R, s_valid=S, r_tile=rt, s_tile=tn,
        need_row_mask=(R % rt) != 0, need_col_mask=(S % tn) != 0)

    prob2, xq2, parts = pl.pallas_call(
        kernel,
        out_shape=(
            jax.ShapeDtypeStruct((R, S), jnp.float32),               # prob
            jax.ShapeDtypeStruct((R, S), jnp.float32),               # round(x)
            jax.ShapeDtypeStruct((num_r, num_s, 1, 1), jnp.float32),  # per-tile bits
        ),
        grid_spec=pltpu.PrefetchScalarGridSpec(
            num_scalar_prefetch=0,
            grid=(num_r, num_s),
            in_specs=[
                pl.BlockSpec((rt, 11), lambda r, s: (r, 0)),   # per-row params
                pl.BlockSpec((rt, tn), lambda r, s: (r, s)),   # x tile
            ],
            out_specs=[
                pl.BlockSpec((rt, tn), lambda r, s: (r, s)),
                pl.BlockSpec((rt, tn), lambda r, s: (r, s)),
                pl.BlockSpec((None, None, 1, 1), lambda r, s: (r, s, 0, 0)),
            ],
        ),
        compiler_params=pltpu.CompilerParams(
            dimension_semantics=("parallel", "parallel")),
    )(p_rows, x2)

    total_bits = jnp.sum(parts)                     # tiny epilogue reduction
    prob = prob2.reshape(B, C, H, W)                # free views, no slicing
    xq = xq2.reshape(B, C, H, W)
    return prob, total_bits, xq


def _reference(x, params):
    """Pure-JAX reference of the eval-mode forward (NCHW, raw params)."""
    p = params  # [C, 11]

    def col(k):
        return p[:, k].reshape(1, -1, 1, 1)

    def bitparm(z, h, b, a):
        z2 = z * jax.nn.softplus(h) + b
        return z2 + jnp.tanh(z2) * jnp.tanh(a)

    def be(z):
        z = bitparm(z, col(0), col(1), col(2))
        z = bitparm(z, col(3), col(4), col(5))
        z = bitparm(z, col(6), col(7), col(8))
        return jax.nn.sigmoid(z * jax.nn.softplus(col(9)) + col(10))

    xr = jnp.round(x)
    prob = be(xr + 0.5) - be(xr - 0.5)
    bits = jnp.clip(-jnp.log(prob + 1e-8) / math.log(2.0), 1e-10, 50.0)
    return prob, jnp.sum(bits), xr


if __name__ == "__main__":
    key = jax.random.PRNGKey(0)

    # --- Test 1: canonical small shape, single full tile -------------------
    B, C, H, W = 2, 4, 16, 16
    k_x, k_p = jax.random.split(key)
    x = jax.random.normal(k_x, (B, C, H, W), dtype=jnp.float32) * 3.0
    # BitParm params: normal(0, 0.01), per-channel; 11 scalars per channel.
    params = 0.01 * jax.random.normal(k_p, (C, 11), dtype=jnp.float32)

    prob, total_bits, x_q = jax.jit(entropy_block_forward)(x, params)
    jax.block_until_ready((prob, total_bits, x_q))

    prob_r, total_r, x_r = _reference(x, params)
    assert prob.shape == (B, C, H, W) and x_q.shape == (B, C, H, W)
    assert jnp.allclose(prob, prob_r, atol=1e-5, rtol=1e-5)
    assert jnp.allclose(x_q, x_r)
    assert jnp.allclose(total_bits, total_r, atol=1e-2, rtol=1e-5)

    # --- Test 2: awkward shape + shrunken tile budget to exercise partial ---
    # edge blocks (row + column masks) without any wrapper-side padding.
    B2, C2, H2, W2 = 2, 5, 16, 25          # R = 10 rows, S = 400 lanes
    k_x2, k_p2 = jax.random.split(jax.random.PRNGKey(1))
    x2 = jax.random.normal(k_x2, (B2, C2, H2, W2), dtype=jnp.float32) * 3.0
    params2 = 0.01 * jax.random.normal(k_p2, (C2, 11), dtype=jnp.float32)

    fwd_small = functools.partial(entropy_block_forward,
                                  tn_max=128, max_tile_elems=8 * 128)
    prob2, total2, xq2 = jax.jit(fwd_small)(x2, params2)
    jax.block_until_ready((prob2, total2, xq2))

    prob2_r, total2_r, xq2_r = _reference(x2, params2)
    assert prob2.shape == (B2, C2, H2, W2) and xq2.shape == (B2, C2, H2, W2)
    assert jnp.allclose(prob2, prob2_r, atol=1e-5, rtol=1e-5)
    assert jnp.allclose(xq2, xq2_r)
    assert jnp.allclose(total2, total2_r, atol=1e-2, rtol=1e-5)

    print("KERNEL_OK")
</pallas_src>

<mosaic_0001>
module attributes {stable_mosaic.version = 11 : i64} {
  func.func @_entropy_kernel(%arg0: i32, %arg1: i32, %arg2: memref<8x11xf32, #tpu.memory_space<vmem>>, %arg3: memref<8x256xf32, #tpu.memory_space<vmem>>, %arg4: memref<8x256xf32, #tpu.memory_space<vmem>>, %arg5: memref<8x256xf32, #tpu.memory_space<vmem>>, %arg6: memref<1x1x1x1xf32, #tpu.memory_space<vmem>>) attributes {dimension_semantics = [#tpu.dimension_semantics<parallel>, #tpu.dimension_semantics<parallel>], iteration_bounds = array<i64: 1, 1>, scalar_prefetch = 0 : i64, scratch_operands = 0 : i64, tpu.core_type = #tpu.core_type<tc>, window_params = [{transform_indices = @transform_0, window_bounds = array<i64: 8, 11>}, {transform_indices = @transform_1, window_bounds = array<i64: 8, 256>}, {transform_indices = @transform_2, window_bounds = array<i64: 8, 256>}, {transform_indices = @transform_3, window_bounds = array<i64: 8, 256>}, {transform_indices = @transform_4, window_bounds = array<i64: 1, 1, 1, 1>}]} {
    %c0 = arith.constant 0 : index
    %c0_0 = arith.constant 0 : index
    %0 = vector.load %arg2[%c0, %c0_0] : memref<8x11xf32, #tpu.memory_space<vmem>>, vector<8x11xf32>
    %c0_1 = arith.constant 0 : index
    %c0_2 = arith.constant 0 : index
    %1 = vector.load %arg3[%c0_1, %c0_2] : memref<8x256xf32, #tpu.memory_space<vmem>>, vector<8x256xf32>
    %2 = math.roundeven %1 : vector<8x256xf32>
    %3 = vector.extract_strided_slice %0 {offsets = [0, 0], sizes = [8, 1], strides = [1, 1]} : vector<8x11xf32> to vector<8x1xf32>
    %4 = vector.extract_strided_slice %0 {offsets = [0, 1], sizes = [8, 1], strides = [1, 1]} : vector<8x11xf32> to vector<8x1xf32>
    %5 = vector.extract_strided_slice %0 {offsets = [0, 2], sizes = [8, 1], strides = [1, 1]} : vector<8x11xf32> to vector<8x1xf32>
    %6 = vector.extract_strided_slice %0 {offsets = [0, 3], sizes = [8, 1], strides = [1, 1]} : vector<8x11xf32> to vector<8x1xf32>
    %7 = vector.extract_strided_slice %0 {offsets = [0, 4], sizes = [8, 1], strides = [1, 1]} : vector<8x11xf32> to vector<8x1xf32>
    %8 = vector.extract_strided_slice %0 {offsets = [0, 5], sizes = [8, 1], strides = [1, 1]} : vector<8x11xf32> to vector<8x1xf32>
    %9 = vector.extract_strided_slice %0 {offsets = [0, 6], sizes = [8, 1], strides = [1, 1]} : vector<8x11xf32> to vector<8x1xf32>
    %10 = vector.extract_strided_slice %0 {offsets = [0, 7], sizes = [8, 1], strides = [1, 1]} : vector<8x11xf32> to vector<8x1xf32>
    %11 = vector.extract_strided_slice %0 {offsets = [0, 8], sizes = [8, 1], strides = [1, 1]} : vector<8x11xf32> to vector<8x1xf32>
    %12 = vector.extract_strided_slice %0 {offsets = [0, 9], sizes = [8, 1], strides = [1, 1]} : vector<8x11xf32> to vector<8x1xf32>
    %13 = vector.extract_strided_slice %0 {offsets = [0, 10], sizes = [8, 1], strides = [1, 1]} : vector<8x11xf32> to vector<8x1xf32>
    %cst = arith.constant 5.000000e-01 : f32
    %14 = vector.broadcast %cst : f32 to vector<8x256xf32>
    %15 = arith.addf %2, %14 : vector<8x256xf32>
    %16 = vector.broadcast %3 : vector<8x1xf32> to vector<8x256xf32>
    %17 = arith.mulf %15, %16 : vector<8x256xf32>
    %18 = vector.broadcast %4 : vector<8x1xf32> to vector<8x256xf32>
    %19 = arith.addf %17, %18 : vector<8x256xf32>
    %20 = math.tanh %19 : vector<8x256xf32>
    %21 = vector.broadcast %5 : vector<8x1xf32> to vector<8x256xf32>
    %22 = arith.mulf %20, %21 : vector<8x256xf32>
    %23 = arith.addf %19, %22 : vector<8x256xf32>
    %24 = vector.broadcast %6 : vector<8x1xf32> to vector<8x256xf32>
    %25 = arith.mulf %23, %24 : vector<8x256xf32>
    %26 = vector.broadcast %7 : vector<8x1xf32> to vector<8x256xf32>
    %27 = arith.addf %25, %26 : vector<8x256xf32>
    %28 = math.tanh %27 : vector<8x256xf32>
    %29 = vector.broadcast %8 : vector<8x1xf32> to vector<8x256xf32>
    %30 = arith.mulf %28, %29 : vector<8x256xf32>
    %31 = arith.addf %27, %30 : vector<8x256xf32>
    %32 = vector.broadcast %9 : vector<8x1xf32> to vector<8x256xf32>
    %33 = arith.mulf %31, %32 : vector<8x256xf32>
    %34 = vector.broadcast %10 : vector<8x1xf32> to vector<8x256xf32>
    %35 = arith.addf %33, %34 : vector<8x256xf32>
    %36 = math.tanh %35 : vector<8x256xf32>
    %37 = vector.broadcast %11 : vector<8x1xf32> to vector<8x256xf32>
    %38 = arith.mulf %36, %37 : vector<8x256xf32>
    %39 = arith.addf %35, %38 : vector<8x256xf32>
    %40 = vector.broadcast %12 : vector<8x1xf32> to vector<8x256xf32>
    %41 = arith.mulf %39, %40 : vector<8x256xf32>
    %42 = vector.broadcast %13 : vector<8x1xf32> to vector<8x256xf32>
    %43 = arith.addf %41, %42 : vector<8x256xf32>
    %cst_3 = arith.constant 5.000000e-01 : f32
    %44 = vector.broadcast %cst_3 : f32 to vector<8x256xf32>
    %45 = arith.mulf %44, %43 : vector<8x256xf32>
    %46 = math.tanh %45 : vector<8x256xf32>
    %cst_4 = arith.constant 1.000000e+00 : f32
    %47 = vector.broadcast %cst_4 : f32 to vector<8x256xf32>
    %48 = arith.addf %46, %47 : vector<8x256xf32>
    %cst_5 = arith.constant 5.000000e-01 : f32
    %49 = vector.broadcast %cst_5 : f32 to vector<8x256xf32>
    %50 = arith.mulf %49, %48 : vector<8x256xf32>
    %cst_6 = arith.constant 5.000000e-01 : f32
    %51 = vector.broadcast %cst_6 : f32 to vector<8x256xf32>
    %52 = arith.subf %2, %51 : vector<8x256xf32>
    %53 = vector.broadcast %3 : vector<8x1xf32> to vector<8x256xf32>
    %54 = arith.mulf %52, %53 : vector<8x256xf32>
    %55 = vector.broadcast %4 : vector<8x1xf32> to vector<8x256xf32>
    %56 = arith.addf %54, %55 : vector<8x256xf32>
    %57 = math.tanh %56 : vector<8x256xf32>
    %58 = vector.broadcast %5 : vector<8x1xf32> to vector<8x256xf32>
    %59 = arith.mulf %57, %58 : vector<8x256xf32>
    %60 = arith.addf %56, %59 : vector<8x256xf32>
    %61 = vector.broadcast %6 : vector<8x1xf32> to vector<8x256xf32>
    %62 = arith.mulf %60, %61 : vector<8x256xf32>
    %63 = vector.broadcast %7 : vector<8x1xf32> to vector<8x256xf32>
    %64 = arith.addf %62, %63 : vector<8x256xf32>
    %65 = math.tanh %64 : vector<8x256xf32>
    %66 = vector.broadcast %8 : vector<8x1xf32> to vector<8x256xf32>
    %67 = arith.mulf %65, %66 : vector<8x256xf32>
    %68 = arith.addf %64, %67 : vector<8x256xf32>
    %69 = vector.broadcast %9 : vector<8x1xf32> to vector<8x256xf32>
    %70 = arith.mulf %68, %69 : vector<8x256xf32>
    %71 = vector.broadcast %10 : vector<8x1xf32> to vector<8x256xf32>
    %72 = arith.addf %70, %71 : vector<8x256xf32>
    %73 = math.tanh %72 : vector<8x256xf32>
    %74 = vector.broadcast %11 : vector<8x1xf32> to vector<8x256xf32>
    %75 = arith.mulf %73, %74 : vector<8x256xf32>
    %76 = arith.addf %72, %75 : vector<8x256xf32>
    %77 = vector.broadcast %12 : vector<8x1xf32> to vector<8x256xf32>
    %78 = arith.mulf %76, %77 : vector<8x256xf32>
    %79 = vector.broadcast %13 : vector<8x1xf32> to vector<8x256xf32>
    %80 = arith.addf %78, %79 : vector<8x256xf32>
    %cst_7 = arith.constant 5.000000e-01 : f32
    %81 = vector.broadcast %cst_7 : f32 to vector<8x256xf32>
    %82 = arith.mulf %81, %80 : vector<8x256xf32>
    %83 = math.tanh %82 : vector<8x256xf32>
    %cst_8 = arith.constant 1.000000e+00 : f32
    %84 = vector.broadcast %cst_8 : f32 to vector<8x256xf32>
    %85 = arith.addf %83, %84 : vector<8x256xf32>
    %cst_9 = arith.constant 5.000000e-01 : f32
    %86 = vector.broadcast %cst_9 : f32 to vector<8x256xf32>
    %87 = arith.mulf %86, %85 : vector<8x256xf32>
    %88 = arith.subf %50, %87 : vector<8x256xf32>
    %c0_10 = arith.constant 0 : index
    %c0_11 = arith.constant 0 : index
    %89 = vector.load %arg4[%c0_10, %c0_11] : memref<8x256xf32, #tpu.memory_space<vmem>>, vector<8x256xf32>
    tpu.vector_store %arg4[%c0_10, %c0_11], %88 {strides = array<i32>} : memref<8x256xf32, #tpu.memory_space<vmem>>, vector<8x256xf32>,
    %c0_12 = arith.constant 0 : index
    %c0_13 = arith.constant 0 : index
    %90 = vector.load %arg5[%c0_12, %c0_13] : memref<8x256xf32, #tpu.memory_space<vmem>>, vector<8x256xf32>
    tpu.vector_store %arg5[%c0_12, %c0_13], %2 {strides = array<i32>} : memref<8x256xf32, #tpu.memory_space<vmem>>, vector<8x256xf32>,
    %cst_14 = arith.constant 9.99999993E-9 : f32
    %91 = vector.broadcast %cst_14 : f32 to vector<8x256xf32>
    %92 = arith.addf %88, %91 : vector<8x256xf32>
    %93 = math.log %92 : vector<8x256xf32>
    %cst_15 = arith.constant 0.000000e+00 : f32
    %94 = vector.broadcast %cst_15 : f32 to vector<8x256xf32>
    %95 = arith.subf %94, %93 : vector<8x256xf32>
    %cst_16 = arith.constant 1.44269502 : f32
    %96 = vector.broadcast %cst_16 : f32 to vector<8x256xf32>
    %97 = arith.mulf %95, %96 : vector<8x256xf32>
    %cst_17 = arith.constant 1.000000e-10 : f32
    %cst_18 = arith.constant 5.000000e+01 : f32
    %98 = vector.broadcast %cst_17 : f32 to vector<8x256xf32>
    %99 = arith.maximumf %98, %97 : vector<8x256xf32>
    %100 = vector.broadcast %cst_18 : f32 to vector<8x256xf32>
    %101 = arith.minimumf %100, %99 : vector<8x256xf32>
    %cst_19 = arith.constant dense<0.000000e+00> : vector<8xf32>
    %102 = vector.multi_reduction <add>, %101, %cst_19 [1] : vector<8x256xf32> to vector<8xf32>
    %103 = vector.shape_cast %102 : vector<8xf32> to vector<8x1xf32>
    %cst_20 = arith.constant dense<0.000000e+00> : vector<1xf32>
    %104 = vector.multi_reduction <add>, %103, %cst_20 [0] : vector<8x1xf32> to vector<1xf32>
    %105 = vector.shape_cast %104 : vector<1xf32> to vector<1x1xf32>
    %c0_21 = arith.constant 0 : index
    %c0_22 = arith.constant 0 : index
    %c0_23 = arith.constant 0 : index
    %c0_24 = arith.constant 0 : index
    %106 = vector.load %arg6[%c0_21, %c0_22, %c0_23, %c0_24] : memref<1x1x1x1xf32, #tpu.memory_space<vmem>>, vector<1x1x1x1xf32>
    %107 = vector.shape_cast %106 : vector<1x1x1x1xf32> to vector<1x1xf32>
    %108 = vector.shape_cast %105 : vector<1x1xf32> to vector<1x1x1x1xf32>
    tpu.vector_store %arg6[%c0_21, %c0_22, %c0_23, %c0_24], %108 {strides = array<i32>} : memref<1x1x1x1xf32, #tpu.memory_space<vmem>>, vector<1x1x1x1xf32>,
    return
  }
  func.func @transform_0(%arg0: i32, %arg1: i32) -> (i32, i32) {
    %c0_i32 = arith.constant 0 : i32
    %c0_i32_0 = arith.constant 0 : i32
    return %arg0, %c0_i32 : i32, i32
  }
  func.func @transform_1(%arg0: i32, %arg1: i32) -> (i32, i32) {
    %c0_i32 = arith.constant 0 : i32
    return %arg0, %arg1 : i32, i32
  }
  func.func @transform_2(%arg0: i32, %arg1: i32) -> (i32, i32) {
    %c0_i32 = arith.constant 0 : i32
    return %arg0, %arg1 : i32, i32
  }
  func.func @transform_3(%arg0: i32, %arg1: i32) -> (i32, i32) {
    %c0_i32 = arith.constant 0 : i32
    return %arg0, %arg1 : i32, i32
  }
  func.func @transform_4(%arg0: i32, %arg1: i32) -> (i32, i32, i32, i32) {
    %c0_i32 = arith.constant 0 : i32
    %c0_i32_0 = arith.constant 0 : i32
    %c0_i32_1 = arith.constant 0 : i32
    return %arg0, %arg1, %c0_i32, %c0_i32_0 : i32, i32, i32, i32
  }
}

</mosaic_0001>

<bundles_post_ra>
// kernel: entropy_block_forward.1
= control target key start
LH: loop header
LB: loop body
LE: loop exit
PB: predicated region body
PF: predicated region fallthrough
CT: control target
= control target key end

     0   :  { %v294_v2 = vmov 0   ;;  %v295_v3 = vmov 2   ;;  %s364_s0 = inlined_call_operand.vmem [shape: f32[8,11], index: 0, kind: input, shape index: {}]   ;;  %s365_s1 = inlined_call_operand.vmem [shape: f32[8,256], index: 1, kind: input, shape index: {}]   ;;  %s366_s2 = inlined_call_operand.vmem [shape: f32[8,256], index: 2, kind: output, shape index: {0}]   ;;  %s367_s3 = inlined_call_operand.vmem [shape: f32[8,256], index: 3, kind: output, shape index: {1}]   ;;  %s368_s4 = inlined_call_operand.hbm [shape: f32[1,1,1,1], index: 4, kind: output, shape index: {2}]  }
   0x1   :  { %v15_v0 = vld [vmem:[%s364_s0] sm:$0xff]  ;;  %222 = vset.pattern.permute.xlu0 %v294_v2  ;;  %224 = vset.pattern.permute.xlu1 %v295_v3  ;;  %v17_v4 = vld [vmem:[%s365_s1 + $0x8] sm:$0xff] }
   0x2   :  { %v16_v1 = vld [vmem:[%s365_s1] sm:$0xff]  ;;  %24 = vperm.xlu0 %222, %v15_v0   ;;  %38 = vperm.xlu1 %224, %v15_v0  }
   0x3   :  { %v208_v5 = vround.rtne.f32 %v16_v1 }
   0x4   :  { %10 = vsyncpa [#allocation3], 0  ;;  %v209_v6 = vround.rtne.f32 %v17_v4  ;;  %v296_v7 = vmov 1   ;;  %v297_v8 = vmov 3   ;;  %v298_v9 = vmov 4  }
   0x5   :  { %157 = vst [vmem:[%s367_s3] sm:$0xff] %v208_v5  ;;  %v299_v10 = vmov 5   ;;  %v300_v11 = vmov 6   ;;  %v301_v12 = vmov 8   ;;  %v302_v13 = vmov 7  }
   0x6   :  { %158 = vst [vmem:[%s367_s3 + $0x8] sm:$0xff] %v209_v6  ;;  %223 = vset.pattern.permute.xlu0 %v296_v7  ;;  %225 = vset.pattern.permute.xlu1 %v297_v8  ;;  %v303_v14 = vmov 10   ;;  %v304_v15 = vmov 9   ;;  %v20_v16 = vadd.f32 0.5, %v208_v5  ;;  %v21_v17 = vadd.f32 0.5, %v209_v6 }
   0x7   :  { %30 = vperm.xlu0 %223, %v15_v0   ;;  %46 = vperm.xlu1 %225, %v15_v0   ;;  %v206_v18 = vadd.f32 -0.5, %v208_v5  ;;  %v207_v20 = vadd.f32 -0.5, %v209_v6  ;;  %vm182_vm0 = vcmask 0  }
   0xb   :  { %226 = vset.pattern.permute.xlu1 %v298_v9  ;;  %227 = vset.pattern.permute.xlu0 %v299_v10 }
   0xc   :  { %52 = vperm.xlu1 %226, %v15_v0   ;;  %60 = vperm.xlu0 %227, %v15_v0  }
  0x10   :  { %228 = vset.pattern.permute.xlu1 %v300_v11  ;;  %230 = vset.pattern.permute.xlu0 %v301_v12 }
  0x11   :  { %68 = vperm.xlu1 %228, %v15_v0   ;;  %82 = vperm.xlu0 %230, %v15_v0  }
  0x15   :  { %229 = vset.pattern.permute.xlu1 %v302_v13  ;;  %233 = vset.pattern.permute.xlu0 %v303_v14 }
  0x16   :  { %74 = vperm.xlu1 %229, %v15_v0  }
  0x1a   :  { %231 = vset.pattern.permute.xlu1 %v304_v15 }
  0x1b   :  { %90 = vperm.xlu1 %231, %v15_v0  }
  0x1f   :  { %232 = vset.pattern.permute.xlu1 %v303_v14 }
  0x20   :  { %96 = vperm.xlu1 %232, %v15_v0  }
  0x81   :  { %v25_v19 = vpop.permute.xlu0 %24  ;;  %v39_v30 = vpop.permute.xlu1 %38 }
  0x82   :  { %v27_v21 = vmul.f32 %v25_v19, %v20_v16  ;;  %v28_v22 = vmul.f32 %v25_v19, %v21_v17  ;;  %v111_v23 = vmul.f32 %v206_v18, %v25_v19  ;;  %v112_v24 = vmul.f32 %v207_v20, %v25_v19 }
  0x86   :  { %v31_v25 = vpop.permute.xlu0 %30  ;;  %v47_v31 = vpop.permute.xlu1 %46 }
  0x87   :  { %v33_v26 = vadd.f32 %v31_v25, %v27_v21  ;;  %v34_v27 = vadd.f32 %v31_v25, %v28_v22  ;;  %v113_v28 = vadd.f32 %v111_v23, %v31_v25  ;;  %v114_v29 = vadd.f32 %v112_v24, %v31_v25 }
  0x89   :  { %234 = vtanh.f32 %v33_v26 }
  0x8a   :  { %236 = vtanh.f32 %v34_v27 }
  0x8b   :  { %238 = vtanh.f32 %v113_v28  ;;  %v53_v42 = vpop.permute.xlu1 %52  ;;  %v61_v53 = vpop.permute.xlu0 %60 }
  0x8c   :  { %240 = vtanh.f32 %v114_v29 }
  0x90   :  { %v69_v54 = vpop.permute.xlu1 %68  ;;  %v83_v12 = vpop.permute.xlu0 %82 }
  0x93   :  { %v235_v32 = vpop.eup %234 }
  0x94   :  { %v237_v33 = vpop.eup %236  ;;  %v41_v34 = vmul.f32 %v235_v32, %v39_v30 }
  0x95   :  { %v239_v35 = vpop.eup %238  ;;  %v42_v36 = vmul.f32 %v237_v33, %v39_v30  ;;  %v75_v1 = vpop.permute.xlu1 %74 }
  0x96   :  { %v241_v37 = vpop.eup %240  ;;  %v117_v38 = vmul.f32 %v239_v35, %v39_v30  ;;  %v43_v39 = vadd.f32 %v41_v34, %v33_v26 }
  0x97   :  { %v118_v40 = vmul.f32 %v241_v37, %v39_v30  ;;  %v44_v41 = vadd.f32 %v42_v36, %v34_v27 }
  0x98   :  { %v49_v43 = vmul.f32 %v47_v31, %v43_v39  ;;  %v119_v44 = vadd.f32 %v117_v38, %v113_v28 }
  0x99   :  { %v50_v45 = vmul.f32 %v47_v31, %v44_v41  ;;  %v120_v46 = vadd.f32 %v118_v40, %v114_v29 }
  0x9a   :  { %v121_v47 = vmul.f32 %v119_v44, %v47_v31  ;;  %v55_v48 = vadd.f32 %v53_v42, %v49_v43  ;;  %v91_v13 = vpop.permute.xlu1 %90 }
  0x9b   :  { %v122_v49 = vmul.f32 %v120_v46, %v47_v31  ;;  %v56_v50 = vadd.f32 %v53_v42, %v50_v45 }
  0x9c   :  { %242 = vtanh.f32 %v55_v48  ;;  %v123_v51 = vadd.f32 %v121_v47, %v53_v42 }
  0x9d   :  { %244 = vtanh.f32 %v56_v50  ;;  %v124_v52 = vadd.f32 %v122_v49, %v53_v42 }
  0x9e   :  { %246 = vtanh.f32 %v123_v51 }
  0x9f   :  { %248 = vtanh.f32 %v124_v52  ;;  %v97_v23 = vpop.permute.xlu1 %96 }
  0xa6   :  { %v243_v55 = vpop.eup %242 }
  0xa7   :  { %v245_v56 = vpop.eup %244  ;;  %v63_v57 = vmul.f32 %v243_v55, %v61_v53 }
  0xa8   :  { %v247_v58 = vpop.eup %246  ;;  %v64_v59 = vmul.f32 %v245_v56, %v61_v53 }
  0xa9   :  { %v249_v60 = vpop.eup %248  ;;  %v127_v61 = vmul.f32 %v247_v58, %v61_v53  ;;  %v65_v62 = vadd.f32 %v63_v57, %v55_v48 }
  0xaa   :  { %v128_v63 = vmul.f32 %v249_v60, %v61_v53  ;;  %v66_v0 = vadd.f32 %v64_v59, %v56_v50 }
  0xab   :  { %v71_v2 = vmul.f32 %v69_v54, %v65_v62  ;;  %v129_v3 = vadd.f32 %v127_v61, %v123_v51 }
  0xac   :  { %v72_v4 = vmul.f32 %v69_v54, %v66_v0  ;;  %v130_v5 = vadd.f32 %v128_v63, %v124_v52 }
  0xad   :  { %v131_v6 = vmul.f32 %v129_v3, %v69_v54  ;;  %v77_v7 = vadd.f32 %v75_v1, %v71_v2 }
  0xae   :  { %v132_v8 = vmul.f32 %v130_v5, %v69_v54  ;;  %v78_v9 = vadd.f32 %v75_v1, %v72_v4 }
  0xaf   :  { %250 = vtanh.f32 %v77_v7  ;;  %v133_v10 = vadd.f32 %v131_v6, %v75_v1 }
  0xb0   :  { %252 = vtanh.f32 %v78_v9  ;;  %v134_v11 = vadd.f32 %v132_v8, %v75_v1 }
  0xb1   :  { %254 = vtanh.f32 %v133_v10 }
  0xb2   :  { %256 = vtanh.f32 %v134_v11 }
  0xb9   :  { %v251_v14 = vpop.eup %250 }
  0xba   :  { %v253_v15 = vpop.eup %252  ;;  %v85_v16 = vmul.f32 %v251_v14, %v83_v12 }
  0xbb   :  { %v255_v17 = vpop.eup %254  ;;  %v86_v18 = vmul.f32 %v253_v15, %v83_v12 }
  0xbc   :  { %v257_v19 = vpop.eup %256  ;;  %v137_v20 = vmul.f32 %v255_v17, %v83_v12  ;;  %v87_v21 = vadd.f32 %v85_v16, %v77_v7 }
  0xbd   :  { %v138_v22 = vmul.f32 %v257_v19, %v83_v12  ;;  %v88_v24 = vadd.f32 %v86_v18, %v78_v9 }
  0xbe   :  { %v93_v25 = vmul.f32 %v91_v13, %v87_v21  ;;  %v139_v26 = vadd.f32 %v137_v20, %v133_v10 }
  0xbf   :  { %v94_v27 = vmul.f32 %v91_v13, %v88_v24  ;;  %v140_v28 = vadd.f32 %v138_v22, %v134_v11 }
  0xc0   :  { %v99_v29 = vadd.f32 %v97_v23, %v93_v25  ;;  %v141_v30 = vmul.f32 %v139_v26, %v91_v13 }
  0xc1   :  { %v100_v31 = vadd.f32 %v97_v23, %v94_v27  ;;  %v142_v32 = vmul.f32 %v140_v28, %v91_v13 }
  0xc2   :  { %v101_v33 = vmul.f32 0.5, %v99_v29  ;;  %v143_v34 = vadd.f32 %v141_v30, %v97_v23 }
  0xc3   :  { %v102_v35 = vmul.f32 0.5, %v100_v31  ;;  %v144_v36 = vadd.f32 %v142_v32, %v97_v23 }
  0xc4   :  { %258 = vtanh.f32 %v101_v33  ;;  %v145_v37 = vmul.f32 0.5, %v143_v34 }
  0xc5   :  { %260 = vtanh.f32 %v102_v35  ;;  %v146_v38 = vmul.f32 0.5, %v144_v36 }
  0xc6   :  { %262 = vtanh.f32 %v145_v37 }
  0xc7   :  { %264 = vtanh.f32 %v146_v38 }
  0xce   :  { %v259_v39 = vpop.eup %258 }
  0xcf   :  { %v261_v40 = vpop.eup %260  ;;  %v105_v41 = vadd.f32 1.0, %v259_v39 }
  0xd0   :  { %v263_v42 = vpop.eup %262  ;;  %v106_v43 = vadd.f32 1.0, %v261_v40 }
  0xd1   :  { %v265_v44 = vpop.eup %264  ;;  %v107_v45 = vmul.f32 0.5, %v105_v41  ;;  %v149_v46 = vadd.f32 1.0, %v263_v42 }
  0xd2   :  { %v108_v47 = vmul.f32 0.5, %v106_v43  ;;  %v150_v48 = vadd.f32 1.0, %v265_v44 }
  0xd3   :  { %v151_v49 = vmul.f32 0.5, %v149_v46 }
  0xd4   :  { %v152_v50 = vmul.f32 0.5, %v150_v48 }
  0xd5   :  { %v153_v51 = vsub.f32 %v107_v45, %v151_v49 }
  0xd6   :  { %v154_v52 = vsub.f32 %v108_v47, %v152_v50 }
  0xd7   :  { %155 = vst [vmem:[%s366_s2] sm:$0xff] %v153_v51  ;;  %v159_v53 = vadd.f32 1e-08, %v153_v51 }
  0xd8   :  { %156 = vst [vmem:[%s366_s2 + $0x8] sm:$0xff] %v154_v52  ;;  %v160_v54 = vadd.f32 1e-08, %v154_v52  ;;  %s305_s2 = smov [#allocation2]  }
  0xd9   :  { %266 = vlog2.f32 %v159_v53  ;;  %s194_s26 = sshll.u32 %s305_s2, 4  ;;  %s195_s26 = int_to_ptr.vmem [resolvable:$true] %s194_s26 }
  0xda   :  { %268 = vlog2.f32 %v160_v54  ;;  %s270_s27 = scalar_lea.vmem %s195_s26, 16  ;;  %s274_s28 = scalar_lea.vmem %s195_s26, 32 }
  0xdb   :  { %p271_p0 = scmp.ne.s32.totalorder %s195_s26, %s270_s27  ;;  %p275_p1 = scmp.lt.s32.totalorder %s195_s26, %s195_s26 }
  0xdc   :  { %p276_p2 = scmp.lt.s32.totalorder %s274_s28, %s270_s27 }
  0xde   :  { %p277_p3 = por %p276_p2, %p275_p1 }
  0xe0   :  { %p278_p4 = pnand %p277_p3, %p271_p0 }
  0xe3   :  { %v267_v55 = vpop.eup %266 }
  0xe4   :  { %v269_v56 = vpop.eup %268  ;;  %v162_v57 = vmul.f32 0.6931472, %v267_v55 }
  0xe5   :  { %v164_v58 = vmul.f32 0.6931472, %v269_v56 }
  0xe6   :  { %v165_v59 = vsub.f32 0.0, %v162_v57 }
  0xe7   :  { %v166_v60 = vsub.f32 0.0, %v164_v58 }
  0xe8   :  { %v167_v61 = vmul.f32 1.442695, %v165_v59 }
  0xe9   :  { %v168_v62 = vmul.f32 1.442695, %v166_v60 }
  0xea   :  { %v169_v63 = vmax.f32 %v167_v61, 1e-10 }
  0xeb   :  { %v170_v0 = vmax.f32 %v168_v62, 1e-10 }
  0xec   :  { %v171_v1 = vmin.f32 %v169_v63, 50.0 }
  0xed   :  { %v172_v2 = vmin.f32 %v170_v0, 50.0 }
  0xef   :  { %v173_v3 = vadd.f32 %v172_v2, %v171_v1 }
  0xf1   :  { %174 = vadd.xlane.f32.xlu0 %v173_v3 }
 0x17e   :  { %v175_v4 = vpop.xlane.xlu0 %174 }
 0x17f   :  { %v176_v5 = vrot.slane %v175_v4, 4 }
 0x181   :  { %v177_v6 = vadd.f32 %v176_v5, %v175_v4 }
 0x183   :  { %v178_v7 = vrot.slane %v177_v6, 2 }
 0x185   :  { %v179_v8 = vadd.f32 %v178_v7, %v177_v6 }
 0x187   :  { %v180_v9 = vrot.slane %v179_v8, 1 }
 0x189   :  { %v181_v10 = vadd.f32 %v180_v9, %v179_v8 }
 0x18b   :  { %183 = vst.msk [vmem:[#allocation2] sm:$0x1] %vm182_vm0, %v181_v10 }
 0x18c   :  { %281 = shalt.err (!%p278_p4)
}
 0x18d   :  { %s282_s5 = scalar_lea.hbm %s368_s4, 16 }
 0x18e   :  { %p283_p5 = scmp.ne.s32.totalorder %s368_s4, %s282_s5  ;;  %p286_p6 = scmp.lt.u32.totalorder %s282_s5, %s368_s4 }
 0x190   :  { %p288_p7 = pnand %p286_p6, %p283_p5 }
 0x192   :  { %291 = shalt.err (!%p288_p7)
}
 0x193   :  { %197 = dma.vmem_to_hbm [thread:$0]  %s195_s26, 16, %s368_s4, [#allocation3]  }
 0x194   :  { %292 = dma.done.wait [#allocation3], 16  }
 0x195   :  { %293 = vsyncadd [#allocation3], 4294967280 }
 0x196   :  { %205 = vsyncpa [#allocation3], 1 }

</bundles_post_ra>
